<compile_context>
chip_gen: v7x
topology: tpu7x:2x2x1
jax: 0.10.0
libtpu: 0.0.40
codegen_flags: <defaults>
</compile_context>

<pallas_src>
import functools

import jax
import jax.numpy as jnp
from jax.experimental import pallas as pl
from jax.experimental.pallas import tpu as pltpu


def _round_up(x, m):
    return (x + m - 1) // m * m


def _cdiv(a, b):
    return (a + b - 1) // b


def _label_contrastive_kernel(code_ref, labt_ref, labels_ref, out_ref,
                              m_ref, l_ref, p_ref,
                              *, inv_temperature, num_classes, block_c,
                              padded_classes):
    j = pl.program_id(1)

    @pl.when(j == 0)
    def _init():
        m_ref[...] = jnp.full(m_ref.shape, -1e30, jnp.float32)
        l_ref[...] = jnp.zeros(l_ref.shape, jnp.float32)
        p_ref[...] = jnp.zeros(p_ref.shape, jnp.float32)

    code = code_ref[...]            # (TB, Dp)  bf16
    labt = labt_ref[...]            # (Dp, TC)  bf16
    labels = labels_ref[...]        # (TB, 1)   int32 (-1 for padded rows)

    # MXU-native (M,K) x (K,N) contraction with f32 accumulation.
    logits = jax.lax.dot_general(
        code, labt,
        dimension_numbers=(((1,), (0,)), ((), ())),
        preferred_element_type=jnp.float32) * inv_temperature     # (TB, TC) f32

    # Global class ids of this C tile, kept (1, TC) and broadcast as needed.
    col_ids = j * block_c + jax.lax.broadcasted_iota(
        jnp.int32, (1, block_c), 1)                                # (1, TC)
    if num_classes < padded_classes:
        # Mask padded classes out of the softmax.
        logits = jnp.where(col_ids < num_classes, logits, jnp.float32(-1e30))

    # Online (flash-style) log-sum-exp update — all f32 (v5e-safe).
    m_prev = m_ref[...]                                            # (TB, 1)
    m_new = jnp.maximum(m_prev, jnp.max(logits, axis=-1, keepdims=True))
    alpha = jnp.exp(m_prev - m_new)
    l_ref[...] = alpha * l_ref[...] + jnp.sum(
        jnp.exp(logits - m_new), axis=-1, keepdims=True)
    m_ref[...] = m_new

    # Target logit pick: matches exactly one column globally; padded batch rows
    # carry label == -1 and never match, padded class columns have ids >= C.
    p_ref[...] = p_ref[...] + jnp.sum(
        jnp.where(col_ids == labels, logits, 0.0), axis=-1, keepdims=True)

    @pl.when(j == pl.num_programs(1) - 1)
    def _finalize():
        lse = m_ref[...] + jnp.log(l_ref[...])                     # (TB, 1)
        valid = (labels >= 0).astype(jnp.float32)                  # drop padded rows
        nll = (lse - p_ref[...]) * valid                           # (TB, 1)
        out_ref[...] = jnp.broadcast_to(jnp.sum(nll), out_ref.shape)


def _tpu_vmem_capacity_bytes():
    try:
        info = pltpu.get_tpu_info()
        return int(getattr(info, "vmem_capacity_bytes", 128 * 1024 * 1024))
    except Exception:
        return 128 * 1024 * 1024


def label_contrastive_loss(code_embeddings, label_embeddings, labels,
                           temperature=0.07, batch_tile=None, class_tile=2048):
    """Pallas implementation of LabelContrastiveLoss.forward (mean CE loss)."""
    B, D = code_embeddings.shape
    C, D2 = label_embeddings.shape
    assert D == D2, (D, D2)

    # Generation-aware knobs.
    vmem_cap = _tpu_vmem_capacity_bytes()
    small_vmem = vmem_cap <= 80 * 1024 * 1024          # v7x: 64 MiB per TensorCore
    vmem_limit = min(vmem_cap * 3 // 4, 112 * 1024 * 1024)  # ~48 MiB v7x / ~96 MiB v5e,v6e
    if batch_tile is None:
        batch_tile = 256 if small_vmem else 512

    # Balance the batch tile across tiles so padding waste stays < 1 sublane granule.
    n_b = _cdiv(B, batch_tile)
    TB = _round_up(_cdiv(B, n_b), 16)                  # bf16 sublane granule
    num_tiles = _cdiv(B, TB)
    Bp = num_tiles * TB

    Dp = _round_up(D, 128)                             # contraction dim (lane-dense)

    # Resident label matrix vs. flash-style C-tiling.
    Cp_res = _round_up(C, 128)
    resident_budget = (16 if small_vmem else 48) * 1024 * 1024
    resident_ok = (Cp_res * Dp * 2 <= resident_budget
                   and TB * Cp_res * 4 <= resident_budget)
    TC = Cp_res if resident_ok else min(class_tile, Cp_res)
    Cp = _round_up(C, TC)
    num_c_tiles = Cp // TC

    # bf16 MXU operands; zero-padding leaves all dot products unchanged.
    code = jnp.zeros((Bp, Dp), jnp.bfloat16).at[:B, :D].set(
        code_embeddings.astype(jnp.bfloat16))
    # One-time XLA transpose in HBM -> MXU-native (K, N) weight layout.
    lab_t = jnp.zeros((Dp, Cp), jnp.bfloat16).at[:D, :C].set(
        label_embeddings.astype(jnp.bfloat16).T)
    # Padded batch rows get label -1 so they contribute exactly 0 to the loss.
    labels_2d = jnp.full((Bp, 1), -1, jnp.int32).at[:B, 0].set(
        labels.astype(jnp.int32))

    kernel = functools.partial(
        _label_contrastive_kernel,
        inv_temperature=float(1.0 / temperature),
        num_classes=C,
        block_c=TC,
        padded_classes=Cp)

    if num_c_tiles == 1:
        # Block index is constant over the whole grid -> never re-DMA'd; a
        # second pipeline buffer would only double the resident footprint.
        labt_spec = pl.BlockSpec((Dp, TC), lambda i, j: (0, j),
                                 pipeline_mode=pl.Buffered(1))
    else:
        labt_spec = pl.BlockSpec((Dp, TC), lambda i, j: (0, j))

    cost = pl.CostEstimate(
        flops=2 * Bp * Cp * Dp,
        transcendentals=Bp * Cp,                       # exp in the online softmax
        bytes_accessed=(2 * Bp * Dp + 2 * num_tiles * Cp * Dp
                        + 4 * Bp + 4 * num_tiles * 8 * 128))

    partials = pl.pallas_call(
        kernel,
        out_shape=jax.ShapeDtypeStruct((num_tiles, 8, 128), jnp.float32),
        grid_spec=pltpu.PrefetchScalarGridSpec(
            num_scalar_prefetch=0,
            grid=(num_tiles, num_c_tiles),
            in_specs=[
                pl.BlockSpec((TB, Dp), lambda i, j: (i, 0)),   # code tile (streamed)
                labt_spec,                                     # label.T tile
                pl.BlockSpec((TB, 1), lambda i, j: (i, 0)),    # labels column
            ],
            out_specs=pl.BlockSpec((1, 8, 128), lambda i, j: (i, 0, 0)),
            scratch_shapes=[pltpu.VMEM((TB, 1), jnp.float32)] * 3,  # m, l, picked
        ),
        compiler_params=pltpu.CompilerParams(
            dimension_semantics=("parallel", "arbitrary"),
            vmem_limit_bytes=int(vmem_limit),
        ),
        cost_estimate=cost,
    )(code, lab_t, labels_2d)

    # Mean over the TRUE batch size (padded rows contributed exactly 0).
    return jnp.sum(partials[:, 0, 0]) / jnp.float32(B)


def _reference_loss(code_embeddings, label_embeddings, labels,
                    temperature=0.07, matmul_dtype=jnp.float32):
    logits = jax.lax.dot_general(
        code_embeddings.astype(matmul_dtype),
        label_embeddings.astype(matmul_dtype),
        dimension_numbers=(((1,), (1,)), ((), ())),
        preferred_element_type=jnp.float32) / temperature
    logz = jax.scipy.special.logsumexp(logits, axis=-1)
    picked = jnp.take_along_axis(logits, labels[:, None], axis=-1)[:, 0]
    return jnp.mean(logz - picked)


if __name__ == "__main__":
    key = jax.random.PRNGKey(0)
    k1, k2, k3 = jax.random.split(key, 3)

    B, C, D = 8, 4, 32   # batch, num label classes, embedding dim
    code = jax.random.normal(k1, (B, D), dtype=jnp.float32)
    label_emb = jax.random.normal(k2, (C, D), dtype=jnp.float32)
    labels = jax.random.randint(k3, (B,), 0, C, dtype=jnp.int32)

    loss = label_contrastive_loss(code, label_emb, labels, temperature=0.07)
    loss = jax.block_until_ready(loss)

    # Tight check against a reference with matched bf16-matmul / f32-accum numerics.
    ref_bf16 = _reference_loss(code, label_emb, labels, 0.07,
                               matmul_dtype=jnp.bfloat16)
    assert jnp.abs(loss - ref_bf16) <= 2e-3 + 2e-3 * jnp.abs(ref_bf16), (loss, ref_bf16)

    # Looser sanity check against the full-f32 reference (bf16 MXU inputs).
    ref_f32 = _reference_loss(code, label_emb, labels, 0.07,
                              matmul_dtype=jnp.float32)
    assert jnp.abs(loss - ref_f32) <= 5e-2 + 5e-2 * jnp.abs(ref_f32), (loss, ref_f32)

    print("KERNEL_OK")
</pallas_src>

<mosaic_0001>
module attributes {stable_mosaic.version = 11 : i64} {
  func.func @_label_contrastive_kernel(%arg0: i32, %arg1: i32, %arg2: memref<16x128xbf16, #tpu.memory_space<vmem>>, %arg3: memref<128x128xbf16, #tpu.memory_space<vmem>>, %arg4: memref<16x1xi32, #tpu.memory_space<vmem>>, %arg5: memref<1x8x128xf32, #tpu.memory_space<vmem>>, %arg6: memref<16x1xf32, #tpu.memory_space<vmem>>, %arg7: memref<16x1xf32, #tpu.memory_space<vmem>>, %arg8: memref<16x1xf32, #tpu.memory_space<vmem>>) attributes {dimension_semantics = [#tpu.dimension_semantics<parallel>, #tpu.dimension_semantics<arbitrary>], iteration_bounds = array<i64: 1, 1>, scalar_prefetch = 0 : i64, scratch_operands = 3 : i64, tpu.core_type = #tpu.core_type<tc>, window_params = [{transform_indices = @transform_0, window_bounds = array<i64: 16, 128>}, {pipeline_mode = #tpu.pipeline_mode<synchronous>, transform_indices = @transform_1, window_bounds = array<i64: 128, 128>}, {transform_indices = @transform_2, window_bounds = array<i64: 16, 1>}, {transform_indices = @transform_3, window_bounds = array<i64: 1, 8, 128>}]} {
    %c0_i32 = arith.constant 0 : i32
    %0 = arith.cmpi eq, %arg1, %c0_i32 : i32
    %1 = arith.extui %0 : i1 to i32
    %c0_i32_0 = arith.constant 0 : i32
    %2 = arith.cmpi ne, %1, %c0_i32_0 : i32
    scf.if %2 {
      %cst_26 = arith.constant -1.000000e+30 : f32
      %48 = vector.broadcast %cst_26 : f32 to vector<16x1xf32>
      %c0_27 = arith.constant 0 : index
      %c0_28 = arith.constant 0 : index
      %49 = vector.load %arg6[%c0_27, %c0_28] : memref<16x1xf32, #tpu.memory_space<vmem>>, vector<16x1xf32>
      tpu.vector_store %arg6[%c0_27, %c0_28], %48 {strides = array<i32>} : memref<16x1xf32, #tpu.memory_space<vmem>>, vector<16x1xf32>,
      %cst_29 = arith.constant 0.000000e+00 : f32
      %50 = vector.broadcast %cst_29 : f32 to vector<16x1xf32>
      %c0_30 = arith.constant 0 : index
      %c0_31 = arith.constant 0 : index
      %51 = vector.load %arg7[%c0_30, %c0_31] : memref<16x1xf32, #tpu.memory_space<vmem>>, vector<16x1xf32>
      tpu.vector_store %arg7[%c0_30, %c0_31], %50 {strides = array<i32>} : memref<16x1xf32, #tpu.memory_space<vmem>>, vector<16x1xf32>,
      %cst_32 = arith.constant 0.000000e+00 : f32
      %52 = vector.broadcast %cst_32 : f32 to vector<16x1xf32>
      %c0_33 = arith.constant 0 : index
      %c0_34 = arith.constant 0 : index
      %53 = vector.load %arg8[%c0_33, %c0_34] : memref<16x1xf32, #tpu.memory_space<vmem>>, vector<16x1xf32>
      tpu.vector_store %arg8[%c0_33, %c0_34], %52 {strides = array<i32>} : memref<16x1xf32, #tpu.memory_space<vmem>>, vector<16x1xf32>,
    } else {
    }
    %c0 = arith.constant 0 : index
    %c0_1 = arith.constant 0 : index
    %3 = vector.load %arg2[%c0, %c0_1] : memref<16x128xbf16, #tpu.memory_space<vmem>>, vector<16x128xbf16>
    %c0_2 = arith.constant 0 : index
    %c0_3 = arith.constant 0 : index
    %4 = vector.load %arg3[%c0_2, %c0_3] : memref<128x128xbf16, #tpu.memory_space<vmem>>, vector<128x128xbf16>
    %c0_4 = arith.constant 0 : index
    %c0_5 = arith.constant 0 : index
    %5 = vector.load %arg4[%c0_4, %c0_5] : memref<16x1xi32, #tpu.memory_space<vmem>>, vector<16x1xi32>
    %cst = arith.constant dense<0.000000e+00> : vector<16x128xf32>
    %6 = tpu.matmul %3, %4, %cst {dimension_numbers = #tpu.dot_dimension_numbers<[1], [0], [0], [1], [0, 0, 1, 1], [], []>} : vector<16x128xbf16>, vector<128x128xbf16>, vector<16x128xf32> -> vector<16x128xf32>
    %cst_6 = arith.constant 14.2857141 : f32
    %7 = vector.broadcast %cst_6 : f32 to vector<16x128xf32>
    %8 = arith.mulf %6, %7 : vector<16x128xf32>
    %c128_i32 = arith.constant 128 : i32
    %9 = arith.muli %arg1, %c128_i32 : i32
    %10 = tpu.iota {dimensions = array<i32: 1>} : vector<1x128xi32>
    %11 = vector.broadcast %9 : i32 to vector<1x128xi32>
    %12 = arith.addi %11, %10 : vector<1x128xi32>
    %c4_i32 = arith.constant 4 : i32
    %13 = vector.broadcast %c4_i32 : i32 to vector<1x128xi32>
    %14 = arith.cmpi slt, %12, %13 : vector<1x128xi32>
    %cst_7 = arith.constant -1.000000e+30 : f32
    %15 = vector.shape_cast %14 : vector<1x128xi1> to vector<1x128xi1>
    %16 = vector.broadcast %15 : vector<1x128xi1> to vector<16x128xi1>
    %17 = vector.broadcast %cst_7 : f32 to vector<16x128xf32>
    %18 = arith.select %16, %8, %17 : vector<16x128xi1>, vector<16x128xf32>
    %c0_8 = arith.constant 0 : index
    %c0_9 = arith.constant 0 : index
    %19 = vector.load %arg6[%c0_8, %c0_9] : memref<16x1xf32, #tpu.memory_space<vmem>>, vector<16x1xf32>
    %cst_10 = arith.constant dense<0xFF800000> : vector<16xf32>
    %20 = vector.multi_reduction <maximumf>, %18, %cst_10 [1] : vector<16x128xf32> to vector<16xf32>
    %21 = vector.shape_cast %20 : vector<16xf32> to vector<16x1xf32>
    %22 = arith.maximumf %19, %21 : vector<16x1xf32>
    %23 = arith.subf %19, %22 : vector<16x1xf32>
    %24 = math.exp %23 : vector<16x1xf32>
    %c0_11 = arith.constant 0 : index
    %c0_12 = arith.constant 0 : index
    %25 = vector.load %arg7[%c0_11, %c0_12] : memref<16x1xf32, #tpu.memory_space<vmem>>, vector<16x1xf32>
    %26 = arith.mulf %24, %25 : vector<16x1xf32>
    %27 = vector.broadcast %22 : vector<16x1xf32> to vector<16x128xf32>
    %28 = arith.subf %18, %27 : vector<16x128xf32>
    %29 = math.exp %28 : vector<16x128xf32>
    %cst_13 = arith.constant dense<0.000000e+00> : vector<16xf32>
    %30 = vector.multi_reduction <add>, %29, %cst_13 [1] : vector<16x128xf32> to vector<16xf32>
    %31 = vector.shape_cast %30 : vector<16xf32> to vector<16x1xf32>
    %32 = arith.addf %26, %31 : vector<16x1xf32>
    %c0_14 = arith.constant 0 : index
    %c0_15 = arith.constant 0 : index
    %33 = vector.load %arg7[%c0_14, %c0_15] : memref<16x1xf32, #tpu.memory_space<vmem>>, vector<16x1xf32>
    tpu.vector_store %arg7[%c0_14, %c0_15], %32 {strides = array<i32>} : memref<16x1xf32, #tpu.memory_space<vmem>>, vector<16x1xf32>,
    %c0_16 = arith.constant 0 : index
    %c0_17 = arith.constant 0 : index
    %34 = vector.load %arg6[%c0_16, %c0_17] : memref<16x1xf32, #tpu.memory_space<vmem>>, vector<16x1xf32>
    tpu.vector_store %arg6[%c0_16, %c0_17], %22 {strides = array<i32>} : memref<16x1xf32, #tpu.memory_space<vmem>>, vector<16x1xf32>,
    %c0_18 = arith.constant 0 : index
    %c0_19 = arith.constant 0 : index
    %35 = vector.load %arg8[%c0_18, %c0_19] : memref<16x1xf32, #tpu.memory_space<vmem>>, vector<16x1xf32>
    %36 = vector.broadcast %12 : vector<1x128xi32> to vector<16x128xi32>
    %37 = vector.broadcast %5 : vector<16x1xi32> to vector<16x128xi32>
    %38 = arith.cmpi eq, %36, %37 : vector<16x128xi32>
    %cst_20 = arith.constant 0.000000e+00 : f32
    %39 = vector.broadcast %cst_20 : f32 to vector<16x128xf32>
    %40 = arith.select %38, %18, %39 : vector<16x128xi1>, vector<16x128xf32>
    %cst_21 = arith.constant dense<0.000000e+00> : vector<16xf32>
    %41 = vector.multi_reduction <add>, %40, %cst_21 [1] : vector<16x128xf32> to vector<16xf32>
    %42 = vector.shape_cast %41 : vector<16xf32> to vector<16x1xf32>
    %43 = arith.addf %35, %42 : vector<16x1xf32>
    %c0_22 = arith.constant 0 : index
    %c0_23 = arith.constant 0 : index
    %44 = vector.load %arg8[%c0_22, %c0_23] : memref<16x1xf32, #tpu.memory_space<vmem>>, vector<16x1xf32>
    tpu.vector_store %arg8[%c0_22, %c0_23], %43 {strides = array<i32>} : memref<16x1xf32, #tpu.memory_space<vmem>>, vector<16x1xf32>,
    %c0_i32_24 = arith.constant 0 : i32
    %45 = arith.cmpi eq, %arg1, %c0_i32_24 : i32
    %46 = arith.extui %45 : i1 to i32
    %c0_i32_25 = arith.constant 0 : i32
    %47 = arith.cmpi ne, %46, %c0_i32_25 : i32
    scf.if %47 {
      %c0_26 = arith.constant 0 : index
      %c0_27 = arith.constant 0 : index
      %48 = vector.load %arg6[%c0_26, %c0_27] : memref<16x1xf32, #tpu.memory_space<vmem>>, vector<16x1xf32>
      %c0_28 = arith.constant 0 : index
      %c0_29 = arith.constant 0 : index
      %49 = vector.load %arg7[%c0_28, %c0_29] : memref<16x1xf32, #tpu.memory_space<vmem>>, vector<16x1xf32>
      %50 = math.log %49 : vector<16x1xf32>
      %51 = arith.addf %48, %50 : vector<16x1xf32>
      %c0_i32_30 = arith.constant 0 : i32
      %52 = vector.broadcast %c0_i32_30 : i32 to vector<16x1xi32>
      %53 = arith.cmpi sge, %5, %52 : vector<16x1xi32>
      %54 = arith.extui %53 : vector<16x1xi1> to vector<16x1xi32>
      %55 = arith.sitofp %54 : vector<16x1xi32> to vector<16x1xf32>
      %c0_31 = arith.constant 0 : index
      %c0_32 = arith.constant 0 : index
      %56 = vector.load %arg8[%c0_31, %c0_32] : memref<16x1xf32, #tpu.memory_space<vmem>>, vector<16x1xf32>
      %57 = arith.subf %51, %56 : vector<16x1xf32>
      %58 = arith.mulf %57, %55 : vector<16x1xf32>
      %59 = vector.shape_cast %58 : vector<16x1xf32> to vector<1x16x1xf32>
      %cst_33 = arith.constant dense<0.000000e+00> : vector<1xf32>
      %60 = vector.multi_reduction <add>, %59, %cst_33 [1, 2] : vector<1x16x1xf32> to vector<1xf32>
      %61 = vector.shape_cast %60 : vector<1xf32> to vector<1x1x1xf32>
      %62 = vector.extract %61[0, 0, 0] : f32 from vector<1x1x1xf32>
      %63 = vector.broadcast %62 : f32 to vector<1x8x128xf32>
      %c0_34 = arith.constant 0 : index
      %c0_35 = arith.constant 0 : index
      %c0_36 = arith.constant 0 : index
      %64 = vector.load %arg5[%c0_34, %c0_35, %c0_36] : memref<1x8x128xf32, #tpu.memory_space<vmem>>, vector<1x8x128xf32>
      tpu.vector_store %arg5[%c0_34, %c0_35, %c0_36], %63 {strides = array<i32>} : memref<1x8x128xf32, #tpu.memory_space<vmem>>, vector<1x8x128xf32>,
    } else {
    }
    return
  }
  func.func @transform_0(%arg0: i32, %arg1: i32) -> (i32, i32) {
    %c0_i32 = arith.constant 0 : i32
    %c0_i32_0 = arith.constant 0 : i32
    return %arg0, %c0_i32 : i32, i32
  }
  func.func @transform_1(%arg0: i32, %arg1: i32) -> (i32, i32) {
    %c0_i32 = arith.constant 0 : i32
    %c0_i32_0 = arith.constant 0 : i32
    return %c0_i32, %arg1 : i32, i32
  }
  func.func @transform_2(%arg0: i32, %arg1: i32) -> (i32, i32) {
    %c0_i32 = arith.constant 0 : i32
    %c0_i32_0 = arith.constant 0 : i32
    return %arg0, %c0_i32 : i32, i32
  }
  func.func @transform_3(%arg0: i32, %arg1: i32) -> (i32, i32, i32) {
    %c0_i32 = arith.constant 0 : i32
    %c0_i32_0 = arith.constant 0 : i32
    %c0_i32_1 = arith.constant 0 : i32
    return %arg0, %c0_i32, %c0_i32_0 : i32, i32, i32
  }
}

</mosaic_0001>

<bundles_post_ra>
// kernel: tpu_custom_call.1
= control target key start
LH: loop header
LB: loop body
LE: loop exit
PB: predicated region body
PF: predicated region fallthrough
CT: control target
= control target key end

     0   :  { %8 = vsyncpa [#allocation6], 0  ;;  %s610_s0 = inlined_call_operand.hbm [shape: bf16[16,128], index: 0, kind: input, shape index: {}]   ;;  %s611_s1 = inlined_call_operand.hbm [shape: bf16[128,128], index: 1, kind: input, shape index: {}]   ;;  %s612_s2 = inlined_call_operand.hbm [shape: s32[16,1], index: 2, kind: input, shape index: {}]   ;;  %s613_s3 = inlined_call_operand.hbm [shape: f32[1,8,128], index: 3, kind: output, shape index: {}]  }
   0x1   :  { %9 = vsyncpa [#allocation9], 0 }
   0x2   :  { %10 = vsyncpa [#allocation7], 0  ;;  %s486_s12 = smov [#allocation8]   ;;  %s487_s14 = smov [#allocation5]  }
   0x3   :  { %s28_s13 = sshll.u32 %s486_s12, 4  ;;  %s16_s15 = sshll.u32 %s487_s14, 4  ;;  %s29_s13 = int_to_ptr.vmem [resolvable:$true] %s28_s13  ;;  %s518_s15 = int_to_ptr.vmem [resolvable:$true] %s16_s15 }
   0x4   :  { %s392_s18 = scalar_lea.hbm %s611_s1, 1024 }
   0x5   :  { %p393_p0 = scmp.ne.s32.totalorder %s611_s1, %s392_s18  ;;  %p396_p1 = scmp.lt.u32.totalorder %s392_s18, %s611_s1 }
   0x7   :  { %p398_p2 = pnand %p396_p1, %p393_p0 }
   0x9   :  { %401 = shalt.err (!%p398_p2)
}
   0xa   :  { %s402_s23 = scalar_lea.vmem %s29_s13, 1024  ;;  %p407_p4 = scmp.lt.s32.totalorder %s29_s13, %s29_s13 }
   0xb   :  { %p403_p3 = scmp.ne.s32.totalorder %s29_s13, %s402_s23  ;;  %p408_p5 = scmp.lt.s32.totalorder %s402_s23, %s402_s23 }
   0xd   :  { %p409_p6 = por %p408_p5, %p407_p4 }
   0xf   :  { %p410_p7 = pnand %p409_p6, %p403_p3 }
  0x11   :  { %413 = shalt.err (!%p410_p7)
}
  0x12   :  { %s488_s24 = smov 64   ;;  %s489_s25 = smov 4  }
  0x13   :  { %34 = dma.hbm_to_vmem [thread:$0]  %s611_s1, 1024, %s29_s13, [#allocation9], %s488_s24, %s488_s24, %s489_s25  }
  0x14   :  { %s414_s30 = scalar_lea.hbm %s610_s0, 128 }
  0x15   :  { %p415_p8 = scmp.ne.s32.totalorder %s610_s0, %s414_s30  ;;  %p418_p9 = scmp.lt.u32.totalorder %s414_s30, %s610_s0 }
  0x17   :  { %p420_p10 = pnand %p418_p9, %p415_p8 }
  0x19   :  { %423 = shalt.err (!%p420_p10)
}
  0x1a   :  { %s424_s8 = scalar_lea.vmem %s518_s15, 128  ;;  %p429_p12 = scmp.lt.s32.totalorder %s518_s15, %s518_s15 }
  0x1b   :  { %p425_p11 = scmp.ne.s32.totalorder %s518_s15, %s424_s8  ;;  %p430_p13 = scmp.lt.s32.totalorder %s424_s8, %s424_s8 }
  0x1d   :  { %p431_p0 = por %p430_p13, %p429_p12 }
  0x1f   :  { %p432_p1 = pnand %p431_p0, %p425_p11 }
  0x21   :  { %435 = shalt.err (!%p432_p1)
}
  0x22   :  { %22 = dma.hbm_to_vmem [thread:$0]  %s610_s0, 128, %s518_s15, [#allocation6], %s488_s24, %s488_s24, %s489_s25  }
  0x23   :  { %s490_s10 = smov [#allocation10]   ;;  %s436_s14 = scalar_lea.hbm %s612_s2, 256 }
  0x24   :  { %s40_s11 = sshll.u32 %s490_s10, 4  ;;  %p437_p2 = scmp.ne.s32.totalorder %s612_s2, %s436_s14  ;;  %s41_s11 = int_to_ptr.vmem [resolvable:$true] %s40_s11 }
  0x25   :  { %p440_p3 = scmp.lt.u32.totalorder %s436_s14, %s612_s2 }
  0x27   :  { %p442_p4 = pnand %p440_p3, %p437_p2 }
  0x29   :  { %445 = shalt.err (!%p442_p4)
}
  0x2a   :  { %s446_s20 = scalar_lea.vmem %s41_s11, 256  ;;  %p451_p6 = scmp.lt.s32.totalorder %s41_s11, %s41_s11 }
  0x2b   :  { %p447_p5 = scmp.ne.s32.totalorder %s41_s11, %s446_s20  ;;  %p452_p7 = scmp.lt.s32.totalorder %s446_s20, %s446_s20 }
  0x2d   :  { %p453_p8 = por %p452_p7, %p451_p6 }
  0x2f   :  { %p454_p9 = pnand %p453_p8, %p447_p5 }
  0x31   :  { %457 = shalt.err (!%p454_p9)
}
  0x32   :  { %s491_s0 = smov 128   ;;  %s492_s15 = smov 8  }
  0x33   :  { %46 = dma.hbm_to_vmem [thread:$0]  %s612_s2, 256, %s41_s11, [#allocation9], %s491_s0, %s491_s0, %s492_s15  }
  0x34   :  { %480 = dma.done.wait [#allocation6], 128  }
  0x35   :  { %481 = vsyncadd [#allocation6], 4294967168 }
  0x36   :  { %482 = dma.done.wait [#allocation9], 1280  }
  0x37   :  { %483 = vsyncadd [#allocation9], 4294966016  ;;  %v493_v0 = vmov 0.0   ;;  %vm494_vm0 = vmmov 0   ;;  %v371_v1 = vld [vmem:[#allocation8] sm:$0xff]   ;;  %v372_v2 = vld [vmem:[#allocation8 + $0x8] sm:$0xff]   ;;  %v186_v12 = vlaneseq }
  0x38   :  { %335 = vmatprep.subr.bf16.mxu0 %v493_v0  ;;  %351 = vmatprep.mubr.msk.bf16.mxu0 %vm494_vm0, %v493_v0  ;;  %v373_v3 = vld [vmem:[#allocation8 + $0x10] sm:$0xff]   ;;  %v374_v4 = vld [vmem:[#allocation8 + $0x18] sm:$0xff]   ;;  %v375_v5 = vld [vmem:[#allocation8 + $0x20] sm:$0xff]   ;;  %v495_v10 = vmov 0   ;;  %vm61_vm1 = vcmask 7168   ;;  %s497_s2 = smov [#allocation11]  }
  0x39   :  { %336 = vmatpush3.bf16.msra.mxu0 %v371_v1  ;;  %v376_v6 = vld [vmem:[#allocation8 + $0x28] sm:$0xff]   ;;  %v377_v7 = vld [vmem:[#allocation8 + $0x30] sm:$0xff]   ;;  %v378_v8 = vld [vmem:[#allocation8 + $0x38] sm:$0xff]   ;;  %370 = vset.pattern.permute.xlu0 %v495_v10  ;;  %v496_v11 = vmov -1e+30   ;;  %64 = vst.msk [vmem:[#allocation3] sm:$0xff] %vm61_vm1, %v493_v0 }
  0x3a   :  { %337 = vmatprep.subr.bf16.mxu0 %v493_v0  ;;  %v379_v9 = vld [vmem:[#allocation5] sm:$0xff]   ;;  %369 = vset.pattern.permute.xlu1 %v495_v10  ;;  %62 = vst.msk [vmem:[#allocation2] sm:$0xff] %vm61_vm1, %v496_v11  ;;  %63 = vst.msk [vmem:[#allocation2 + $0x8] sm:$0xff] %vm61_vm1, %v496_v11  ;;  %v187_v13 = vand.u32 127, %v186_v12  ;;  %v580_v22 = vld [vmem:[#allocation10] sm:$0xff]  ;;  %s305_s23 = sshll.u32 %s497_s2, 4  ;;  %s306_s23 = int_to_ptr.vmem [resolvable:$true] %s305_s23 }
  0x3b   :  { %65 = vst.msk [vmem:[#allocation3 + $0x8] sm:$0xff] %vm61_vm1, %v493_v0  ;;  %66 = vst.msk [vmem:[#allocation4] sm:$0xff] %vm61_vm1, %v493_v0  ;;  %v585_v31 = vld [vmem:[#allocation10 + $0x8] sm:$0xff]  ;;  %vm273_vm5 = vcmp.ge.s32.totalorder %v580_v22, 0  ;;  %s458_s25 = scalar_lea.vmem %s306_s23, 128  ;;  %p463_p11 = scmp.lt.s32.totalorder %s306_s23, %s306_s23 }
  0x3c   :  { %67 = vst.msk [vmem:[#allocation4 + $0x8] sm:$0xff] %vm61_vm1, %v493_v0  ;;  %vm190_vm2 = vcmp.lt.s32.totalorder %v187_v13, 4  ;;  %vm274_vm6 = vcmp.ge.s32.totalorder %v585_v31, 0  ;;  %p459_p10 = scmp.ne.s32.totalorder %s306_s23, %s458_s25  ;;  %p464_p12 = scmp.lt.s32.totalorder %s458_s25, %s458_s25 }
  0x3d   :  { %338 = vmatpush3.bf16.msra.mxu0 %v372_v2  ;;  %v325_v12 = vsel %vm274_vm6, 1.0, %v493_v0 }
  0x3e   :  { %339 = vmatprep.subr.bf16.mxu0 %v493_v0  ;;  %p465_p13 = por %p464_p12, %p463_p11 }
  0x40   :  { %v209_v50 = vld [vmem:[#allocation3] sm:$0xff]  ;;  %p466_p0 = pnand %p465_p13, %p459_p10 }
  0x41   :  { %340 = vmatpush3.bf16.msra.mxu0 %v373_v3  ;;  %v195_v23 = vld [vmem:[#allocation2] sm:$0xff]  ;;  %v196_v26 = vld [vmem:[#allocation2 + $0x8] sm:$0xff] }
  0x42   :  { %341 = vmatprep.subr.bf16.mxu0 %v493_v0  ;;  %v240_v44 = vld [vmem:[#allocation4] sm:$0xff]  ;;  %v210_v54 = vld [vmem:[#allocation3 + $0x8] sm:$0xff] }
  0x43   :  { %v241_v59 = vld [vmem:[#allocation4 + $0x8] sm:$0xff] }
  0x45   :  { %342 = vmatpush3.bf16.msra.mxu0 %v374_v4 }
  0x46   :  { %343 = vmatprep.subr.bf16.mxu0 %v493_v0 }
  0x49   :  { %344 = vmatpush3.bf16.msra.mxu0 %v375_v5 }
  0x4a   :  { %345 = vmatprep.subr.bf16.mxu0 %v493_v0 }
  0x4d   :  { %346 = vmatpush3.bf16.msra.mxu0 %v376_v6 }
  0x4e   :  { %347 = vmatprep.subr.bf16.mxu0 %v493_v0 }
  0x51   :  { %348 = vmatpush3.bf16.msra.mxu0 %v377_v7 }
  0x52   :  { %349 = vmatprep.subr.bf16.mxu0 %v493_v0 }
  0x55   :  { %350 = vmatpush3.bf16.msra.mxu0 %v378_v8 }
  0x58   :  { %352 = vmatmul.mubr.bf16.vlgmr.msra.gmra.mrb[0].mxu0 %v379_v9  ;;  %v324_v9 = vsel %vm273_vm5, 1.0, %v493_v0 }
 0x12b   :  { %v176_v14 = vpop.f32.mrb[0].mxu0 }
 0x12c   :  { %v183_v15 = vmul.f32 14.285714, %v176_v14  ;;  %v353_v16 = vpop.f32.mrb[1].mxu0 }
 0x12d   :  { %v179_v17 = vpop.f32.mrb[2].mxu0 }
 0x12e   :  { %v184_v18 = vmul.f32 14.285714, %v179_v17  ;;  %v354_v19 = vpop.f32.mrb[3].mxu0  ;;  %v193_v20 = vsel %vm190_vm2, %v183_v15, -1e+30 }
 0x12f   :  { %197 = vmax.xlane.f32.xlu0 %v193_v20 }
 0x130   :  { %v194_v21 = vsel %vm190_vm2, %v184_v18, -1e+30 }
 0x133   :  { %199 = vmax.xlane.f32.xlu0 %v194_v21 }
 0x149   :  { %243 = vperm.xlu0 %370, %v580_v22  }
 0x1bc   :  { %v198_v24 = vpop.xlane.xlu0 %197 }
 0x1bd   :  { %v201_v25 = vmax.f32 %v195_v23, %v198_v24 }
 0x1bf   :  { %v203_v27 = vsub.f32 %v195_v23, %v201_v25  ;;  %238 = vst.msk [vmem:[#allocation2] sm:$0xff] %vm61_vm1, %v201_v25  ;;  %215 = vperm.xlu1 %369, %v201_v25  }
 0x1c0   :  { %v200_v28 = vpop.xlane.xlu0 %199 }
 0x1c1   :  { %v202_v29 = vmax.f32 %v196_v26, %v200_v28  ;;  %v205_v47 = vmul.f32 1.442695, %v203_v27 }
 0x1c3   :  { %v204_v30 = vsub.f32 %v196_v26, %v202_v29  ;;  %239 = vst.msk [vmem:[#allocation2 + $0x8] sm:$0xff] %vm61_vm1, %v202_v29  ;;  %220 = vperm.xlu1 %369, %v202_v29  }
 0x1c5   :  { %v207_v48 = vmul.f32 1.442695, %v204_v30 }
 0x1c6   :  { %v263_v3 = vld [vmem:[#allocation2] sm:$0xff] }
 0x1c7   :  { %246 = vperm.xlu1 %369, %v585_v31  }
 0x1c8   :  { %v244_v32 = vpop.permute.xlu0 %243 }
 0x1c9   :  { %vm248_vm3 = vcmp.eq.s32.totalorder %v187_v13, %v244_v32 }
 0x1ca   :  { %v250_v33 = vsel %vm248_vm3, %v193_v20, 0.0  ;;  %v264_v10 = vld [vmem:[#allocation2 + $0x8] sm:$0xff] }
 0x1cb   :  { %252 = vadd.xlane.f32.xlu0 %v250_v33 }
 0x23e   :  { %v216_v34 = vpop.permute.xlu1 %215 }
 0x23f   :  { %v223_v35 = vsub.f32 %v193_v20, %v216_v34 }
 0x241   :  { %v225_v36 = vmul.f32 1.442695, %v223_v35 }
 0x242   :  { %v221_v37 = vpop.permute.xlu1 %220 }
 0x243   :  { %380 = vpow2.f32 %v225_v36  ;;  %v224_v38 = vsub.f32 %v194_v21, %v221_v37 }
 0x245   :  { %v227_v39 = vmul.f32 1.442695, %v224_v38 }
 0x246   :  { %v247_v41 = vpop.permute.xlu1 %246 }
 0x247   :  { %382 = vpow2.f32 %v227_v39  ;;  %vm249_vm4 = vcmp.eq.s32.totalorder %v187_v13, %v247_v41 }
 0x248   :  { %v251_v43 = vsel %vm249_vm4, %v194_v21, 0.0  ;;  %384 = vpow2.f32 %v205_v47 }
 0x249   :  { %386 = vpow2.f32 %v207_v48 }
 0x24d   :  { %v381_v40 = vpop.eup %380 }
 0x24e   :  { %229 = vadd.xlane.f32.xlu1 %v381_v40 }
 0x251   :  { %v383_v42 = vpop.eup %382 }
 0x252   :  { %231 = vadd.xlane.f32.xlu1 %v383_v42  ;;  %v385_v49 = vpop.eup %384 }
 0x253   :  { %v211_v51 = vmul.f32 %v385_v49, %v209_v50  ;;  %v387_v52 = vpop.eup %386 }
 0x254   :  { %v212_v56 = vmul.f32 %v387_v52, %v210_v54 }
 0x256   :  { %254 = vadd.xlane.f32.xlu1 %v251_v43 }
 0x258   :  { %v253_v45 = vpop.xlane.xlu0 %252 }
 0x259   :  { %v256_v46 = vadd.f32 %v253_v45, %v240_v44 }
 0x25b   :  { %258 = vst.msk [vmem:[#allocation4] sm:$0xff] %vm61_vm1, %v256_v46 }
 0x262   :  { %v279_v6 = vld [vmem:[#allocation4] sm:$0xff] }
 0x2db   :  { %v230_v53 = vpop.xlane.xlu1 %229 }
 0x2dc   :  { %v233_v55 = vadd.f32 %v230_v53, %v211_v51 }
 0x2de   :  { %236 = vst.msk [vmem:[#allocation3] sm:$0xff] %vm61_vm1, %v233_v55 }
 0x2df   :  { %v232_v57 = vpop.xlane.xlu1 %231 }
 0x2e0   :  { %v234_v58 = vadd.f32 %v232_v57, %v212_v56 }
 0x2e2   :  { %237 = vst.msk [vmem:[#allocation3 + $0x8] sm:$0xff] %vm61_vm1, %v234_v58 }
 0x2e3   :  { %v255_v60 = vpop.xlane.xlu1 %254 }
 0x2e4   :  { %v257_v61 = vadd.f32 %v255_v60, %v241_v59 }
 0x2e5   :  { %v265_v62 = vld [vmem:[#allocation3] sm:$0xff] }
 0x2e6   :  { %259 = vst.msk [vmem:[#allocation4 + $0x8] sm:$0xff] %vm61_vm1, %v257_v61  ;;  %388 = vlog2.f32 %v265_v62 }
 0x2e9   :  { %v266_v63 = vld [vmem:[#allocation3 + $0x8] sm:$0xff] }
 0x2ea   :  { %390 = vlog2.f32 %v266_v63 }
 0x2ed   :  { %v280_v13 = vld [vmem:[#allocation4 + $0x8] sm:$0xff] }
 0x2f0   :  { %v389_v1 = vpop.eup %388 }
 0x2f1   :  { %v268_v2 = vmul.f32 0.6931472, %v389_v1 }
 0x2f3   :  { %v271_v4 = vadd.f32 %v268_v2, %v263_v3 }
 0x2f4   :  { %v391_v5 = vpop.eup %390 }
 0x2f5   :  { %v270_v7 = vmul.f32 0.6931472, %v391_v5  ;;  %v281_v8 = vsub.f32 %v271_v4, %v279_v6 }
 0x2f7   :  { %v272_v11 = vadd.f32 %v270_v7, %v264_v10  ;;  %v283_v15 = vmul.f32 %v324_v9, %v281_v8 }
 0x2f9   :  { %v282_v14 = vsub.f32 %v272_v11, %v280_v13  ;;  %v285_v17 = vsel %vm61_vm1, %v283_v15, 0.0 }
 0x2fb   :  { %v284_v16 = vmul.f32 %v325_v12, %v282_v14 }
 0x2fd   :  { %v286_v18 = vsel %vm61_vm1, %v284_v16, 0.0 }
 0x2fe   :  { %v287_v19 = vadd.f32 %v286_v18, %v285_v17 }
 0x300   :  { %288 = vadd.xlane.f32.xlu1 %v287_v19 }
 0x38d   :  { %v289_v20 = vpop.xlane.xlu1 %288 }
 0x38e   :  { %v290_v21 = vrot.slane %v289_v20, 4 }
 0x390   :  { %v291_v22 = vadd.f32 %v290_v21, %v289_v20 }
 0x392   :  { %v292_v23 = vrot.slane %v291_v22, 2 }
 0x394   :  { %v293_v24 = vadd.f32 %v292_v23, %v291_v22 }
 0x396   :  { %v294_v25 = vrot.slane %v293_v24, 1 }
 0x398   :  { %v295_v26 = vadd.f32 %v294_v25, %v293_v24 }
 0x39a   :  { %355 = vpush %v295_v26 }
 0x3cb   :  { %s356_s24 = spop %355 }
 0x3cc   :  { %v297_v0 = vstv %s356_s24 }
 0x3cd   :  { %298 = vst [vmem:[#allocation11] sm:$0xff] %v297_v0 }
 0x3ce   :  { %469 = shalt.err (!%p466_p0)
}
 0x3cf   :  { %s470_s28 = scalar_lea.hbm %s613_s3, 128 }
 0x3d0   :  { %p471_p1 = scmp.ne.s32.totalorder %s613_s3, %s470_s28  ;;  %p474_p2 = scmp.lt.u32.totalorder %s470_s28, %s613_s3 }
 0x3d2   :  { %p476_p3 = pnand %p474_p2, %p471_p1 }
 0x3d4   :  { %479 = shalt.err (!%p476_p3)
}
 0x3d5   :  { %308 = dma.vmem_to_hbm [thread:$0]  %s306_s23, 128, %s613_s3, [#allocation7]  }
 0x3d6   :  { %484 = dma.done.wait [#allocation7], 128  }
 0x3d7   :  { %485 = vsyncadd [#allocation7], 4294967168 }
 0x3d8   :  { %312 = vsyncpa [#allocation6], 1 }
 0x3d9   :  { %313 = vsyncpa [#allocation9], 1 }
 0x3da   :  { %314 = vsyncpa [#allocation7], 1 }

</bundles_post_ra>
